<compile_context>
chip_gen: v7x
topology: tpu7x:2x2x1
jax: 0.10.0
libtpu: 0.0.40
codegen_flags: <defaults>
</compile_context>

<pallas_src>
import jax
import jax.numpy as jnp
import numpy as np
from jax.experimental import pallas as pl
from jax.experimental.pallas import tpu as pltpu

IN_DIM = 13
HID_DIM = 26
OUT_DIM = 3
LANE = 128


def _round_up(n, m):
    return ((n + m - 1) // m) * m


def mlp_kernel(x_ref, w1_ref, b1_ref, w2_ref, b2_ref, w3_ref, b3_ref, o_ref):
    # x block: (IN_DIM, TB) bf16 — features on sublanes, batch on lanes (lane-dense).
    x = x_ref[...]

    # Layer 1: (HID, IN) @ (IN, TB) -> (HID, TB); f32 accumulation on the MXU.
    z1 = jnp.dot(w1_ref[...], x, preferred_element_type=jnp.float32) + b1_ref[...]
    # sigmoid(z) = 0.5 * tanh(0.5 * z) + 0.5  -> single EUP push per element, f32 math.
    h1 = 0.5 * jnp.tanh(0.5 * z1) + 0.5

    # Layer 2: (HID, HID) @ (HID, TB) -> (HID, TB); bf16 MXU inputs, f32 accumulate.
    z2 = jnp.dot(w2_ref[...], h1.astype(w2_ref.dtype),
                 preferred_element_type=jnp.float32) + b2_ref[...]
    h2 = 0.5 * jnp.tanh(0.5 * z2) + 0.5

    # Output layer: (OUT, HID) @ (HID, TB) -> (OUT, TB); lane-dense store.
    out = jnp.dot(w3_ref[...], h2.astype(w3_ref.dtype),
                  preferred_element_type=jnp.float32) + b3_ref[...]
    o_ref[...] = out.astype(o_ref.dtype)


def classification_forward(x, params, *, block_batch=16384):
    """x: (B, 13) -> (B, 3).  Weights in PyTorch layout (out, in); biases (out, 1)."""
    w1, b1, w2, b2, w3, b3 = params
    B = x.shape[0]

    # Batch lives on the lane axis, so the tile TB must be a multiple of 128.
    B_lanes = _round_up(max(B, 1), LANE)
    TB = min(block_batch, B_lanes)
    # v7x has 2 TensorCores: keep >=2 grid steps (when the batch allows it) so the
    # "parallel" grid axis can actually be sharded across both cores.
    if B_lanes >= 2 * LANE:
        TB = min(TB, _round_up(pl.cdiv(B_lanes, 2), LANE))
    TB = max(TB, LANE)
    B_pad = _round_up(B, TB)
    grid = (B_pad // TB,)

    # Repack x to (IN_DIM, B_pad) bf16: contiguous lane-dense rows, ~8x smaller VMEM
    # tiles than a (TB, 13) layout, and the kernel needs no relayout/transpose.
    x_t = x.astype(jnp.bfloat16).T
    if B_pad != B:
        x_t = jnp.pad(x_t, ((0, 0), (0, B_pad - B)))

    w1b, w2b, w3b = (w.astype(jnp.bfloat16) for w in (w1, w2, w3))
    b1f, b2f, b3f = (b.astype(jnp.float32) for b in (b1, b2, b3))

    cost = pl.CostEstimate(
        flops=2 * B_pad * (IN_DIM * HID_DIM + HID_DIM * HID_DIM + HID_DIM * OUT_DIM),
        transcendentals=B_pad * 2 * HID_DIM,
        bytes_accessed=B_pad * (IN_DIM * 2 + OUT_DIM * 4),
    )

    def const_spec(a):
        # Weights/biases (~3 KB total in bf16/f32) stay VMEM-resident across the grid.
        return pl.BlockSpec(a.shape, lambda i: (0,) * a.ndim)

    out_t = pl.pallas_call(
        mlp_kernel,
        out_shape=jax.ShapeDtypeStruct((OUT_DIM, B_pad), jnp.float32),
        grid=grid,
        in_specs=[
            pl.BlockSpec((IN_DIM, TB), lambda i: (0, i)),   # streamed x tiles
            const_spec(w1b), const_spec(b1f),
            const_spec(w2b), const_spec(b2f),
            const_spec(w3b), const_spec(b3f),
        ],
        out_specs=pl.BlockSpec((OUT_DIM, TB), lambda i: (0, i)),  # lane-dense output
        compiler_params=pltpu.CompilerParams(
            dimension_semantics=("parallel",),
        ),
        cost_estimate=cost,
    )(x_t, w1b, b1f, w2b, b2f, w3b, b3f)

    # (OUT, B_pad) -> (B, OUT); squeeze(-1) of the PyTorch module is a no-op (dim=3).
    return out_t.T[:B]


def init_params(key):
    """PyTorch-style init U(-1/sqrt(fan_in), 1/sqrt(fan_in)), weights stored (out, in)."""
    def linear(key, fan_in, fan_out):
        kw, kb = jax.random.split(key)
        bound = 1.0 / np.sqrt(fan_in)
        w = jax.random.uniform(kw, (fan_out, fan_in), jnp.float32, -bound, bound)
        b = jax.random.uniform(kb, (fan_out, 1), jnp.float32, -bound, bound)
        return w, b

    k1, k2, k3 = jax.random.split(key, 3)
    w1, b1 = linear(k1, IN_DIM, HID_DIM)
    w2, b2 = linear(k2, HID_DIM, HID_DIM)
    w3, b3 = linear(k3, HID_DIM, OUT_DIM)
    return (w1, b1, w2, b2, w3, b3)


def reference_forward(x, params):
    """Pure-f32 reference matching the PyTorch forward."""
    w1, b1, w2, b2, w3, b3 = params
    h1 = jax.nn.sigmoid(x @ w1.T + b1[:, 0])
    h2 = jax.nn.sigmoid(h1 @ w2.T + b2[:, 0])
    out = h2 @ w3.T + b3[:, 0]
    return jnp.squeeze(out, axis=-1) if out.shape[-1] == 1 else out


if __name__ == "__main__":
    key = jax.random.PRNGKey(0)
    kx, kp = jax.random.split(key)

    batch = 8
    x = jax.random.normal(kx, (batch, IN_DIM), jnp.float32)
    params = init_params(kp)

    out = jax.block_until_ready(classification_forward(x, params))

    ref = reference_forward(x, params)
    assert out.shape == (batch, OUT_DIM), out.shape
    # bf16 MXU inputs (f32 accumulation) -> loose-but-tight-enough tolerance vs f32 ref.
    np.testing.assert_allclose(np.asarray(out), np.asarray(ref), rtol=3e-2, atol=3e-2)

    print("KERNEL_OK")
</pallas_src>

<mosaic_0001>
module attributes {stable_mosaic.version = 11 : i64} {
  func.func @mlp_kernel(%arg0: i32, %arg1: memref<13x128xbf16, #tpu.memory_space<vmem>>, %arg2: memref<26x13xbf16, #tpu.memory_space<vmem>>, %arg3: memref<26x1xf32, #tpu.memory_space<vmem>>, %arg4: memref<26x26xbf16, #tpu.memory_space<vmem>>, %arg5: memref<26x1xf32, #tpu.memory_space<vmem>>, %arg6: memref<3x26xbf16, #tpu.memory_space<vmem>>, %arg7: memref<3x1xf32, #tpu.memory_space<vmem>>, %arg8: memref<3x128xf32, #tpu.memory_space<vmem>>) attributes {dimension_semantics = [#tpu.dimension_semantics<parallel>], iteration_bounds = array<i64: 1>, scalar_prefetch = 0 : i64, scratch_operands = 0 : i64, tpu.core_type = #tpu.core_type<tc>, window_params = [{transform_indices = @transform_0, window_bounds = array<i64: 13, 128>}, {pipeline_mode = #tpu.pipeline_mode<synchronous>, transform_indices = @transform_1, window_bounds = array<i64: 26, 13>}, {pipeline_mode = #tpu.pipeline_mode<synchronous>, transform_indices = @transform_2, window_bounds = array<i64: 26, 1>}, {pipeline_mode = #tpu.pipeline_mode<synchronous>, transform_indices = @transform_3, window_bounds = array<i64: 26, 26>}, {pipeline_mode = #tpu.pipeline_mode<synchronous>, transform_indices = @transform_4, window_bounds = array<i64: 26, 1>}, {pipeline_mode = #tpu.pipeline_mode<synchronous>, transform_indices = @transform_5, window_bounds = array<i64: 3, 26>}, {pipeline_mode = #tpu.pipeline_mode<synchronous>, transform_indices = @transform_6, window_bounds = array<i64: 3, 1>}, {transform_indices = @transform_7, window_bounds = array<i64: 3, 128>}]} {
    %c0 = arith.constant 0 : index
    %c0_0 = arith.constant 0 : index
    %0 = vector.load %arg1[%c0, %c0_0] : memref<13x128xbf16, #tpu.memory_space<vmem>>, vector<13x128xbf16>
    %c0_1 = arith.constant 0 : index
    %c0_2 = arith.constant 0 : index
    %1 = vector.load %arg2[%c0_1, %c0_2] : memref<26x13xbf16, #tpu.memory_space<vmem>>, vector<26x13xbf16>
    %cst = arith.constant dense<0.000000e+00> : vector<26x128xf32>
    %2 = tpu.matmul %1, %0, %cst {dimension_numbers = #tpu.dot_dimension_numbers<[1], [0], [0], [1], [0, 0, 1, 1], [], []>} : vector<26x13xbf16>, vector<13x128xbf16>, vector<26x128xf32> -> vector<26x128xf32>
    %c0_3 = arith.constant 0 : index
    %c0_4 = arith.constant 0 : index
    %3 = vector.load %arg3[%c0_3, %c0_4] : memref<26x1xf32, #tpu.memory_space<vmem>>, vector<26x1xf32>
    %4 = vector.broadcast %3 : vector<26x1xf32> to vector<26x128xf32>
    %5 = arith.addf %2, %4 : vector<26x128xf32>
    %cst_5 = arith.constant 5.000000e-01 : f32
    %6 = vector.broadcast %cst_5 : f32 to vector<26x128xf32>
    %7 = arith.mulf %6, %5 : vector<26x128xf32>
    %8 = math.tanh %7 : vector<26x128xf32>
    %cst_6 = arith.constant 5.000000e-01 : f32
    %9 = vector.broadcast %cst_6 : f32 to vector<26x128xf32>
    %10 = arith.mulf %9, %8 : vector<26x128xf32>
    %cst_7 = arith.constant 5.000000e-01 : f32
    %11 = vector.broadcast %cst_7 : f32 to vector<26x128xf32>
    %12 = arith.addf %10, %11 : vector<26x128xf32>
    %c0_8 = arith.constant 0 : index
    %c0_9 = arith.constant 0 : index
    %13 = vector.load %arg4[%c0_8, %c0_9] : memref<26x26xbf16, #tpu.memory_space<vmem>>, vector<26x26xbf16>
    %14 = arith.truncf %12 : vector<26x128xf32> to vector<26x128xbf16>
    %cst_10 = arith.constant dense<0.000000e+00> : vector<26x128xf32>
    %15 = tpu.matmul %13, %14, %cst_10 {dimension_numbers = #tpu.dot_dimension_numbers<[1], [0], [0], [1], [0, 0, 1, 1], [], []>} : vector<26x26xbf16>, vector<26x128xbf16>, vector<26x128xf32> -> vector<26x128xf32>
    %c0_11 = arith.constant 0 : index
    %c0_12 = arith.constant 0 : index
    %16 = vector.load %arg5[%c0_11, %c0_12] : memref<26x1xf32, #tpu.memory_space<vmem>>, vector<26x1xf32>
    %17 = vector.broadcast %16 : vector<26x1xf32> to vector<26x128xf32>
    %18 = arith.addf %15, %17 : vector<26x128xf32>
    %cst_13 = arith.constant 5.000000e-01 : f32
    %19 = vector.broadcast %cst_13 : f32 to vector<26x128xf32>
    %20 = arith.mulf %19, %18 : vector<26x128xf32>
    %21 = math.tanh %20 : vector<26x128xf32>
    %cst_14 = arith.constant 5.000000e-01 : f32
    %22 = vector.broadcast %cst_14 : f32 to vector<26x128xf32>
    %23 = arith.mulf %22, %21 : vector<26x128xf32>
    %cst_15 = arith.constant 5.000000e-01 : f32
    %24 = vector.broadcast %cst_15 : f32 to vector<26x128xf32>
    %25 = arith.addf %23, %24 : vector<26x128xf32>
    %c0_16 = arith.constant 0 : index
    %c0_17 = arith.constant 0 : index
    %26 = vector.load %arg6[%c0_16, %c0_17] : memref<3x26xbf16, #tpu.memory_space<vmem>>, vector<3x26xbf16>
    %27 = arith.truncf %25 : vector<26x128xf32> to vector<26x128xbf16>
    %cst_18 = arith.constant dense<0.000000e+00> : vector<3x128xf32>
    %28 = tpu.matmul %26, %27, %cst_18 {dimension_numbers = #tpu.dot_dimension_numbers<[1], [0], [0], [1], [0, 0, 1, 1], [], []>} : vector<3x26xbf16>, vector<26x128xbf16>, vector<3x128xf32> -> vector<3x128xf32>
    %c0_19 = arith.constant 0 : index
    %c0_20 = arith.constant 0 : index
    %29 = vector.load %arg7[%c0_19, %c0_20] : memref<3x1xf32, #tpu.memory_space<vmem>>, vector<3x1xf32>
    %30 = vector.broadcast %29 : vector<3x1xf32> to vector<3x128xf32>
    %31 = arith.addf %28, %30 : vector<3x128xf32>
    %c0_21 = arith.constant 0 : index
    %c0_22 = arith.constant 0 : index
    %32 = vector.load %arg8[%c0_21, %c0_22] : memref<3x128xf32, #tpu.memory_space<vmem>>, vector<3x128xf32>
    tpu.vector_store %arg8[%c0_21, %c0_22], %31 {strides = array<i32>} : memref<3x128xf32, #tpu.memory_space<vmem>>, vector<3x128xf32>,
    return
  }
  func.func @transform_0(%arg0: i32) -> (i32, i32) {
    %c0_i32 = arith.constant 0 : i32
    %c0_i32_0 = arith.constant 0 : i32
    return %c0_i32, %arg0 : i32, i32
  }
  func.func @transform_1(%arg0: i32) -> (i32, i32) {
    %c0_i32 = arith.constant 0 : i32
    %c0_i32_0 = arith.constant 0 : i32
    %c0_i32_1 = arith.constant 0 : i32
    return %c0_i32, %c0_i32_0 : i32, i32
  }
  func.func @transform_2(%arg0: i32) -> (i32, i32) {
    %c0_i32 = arith.constant 0 : i32
    %c0_i32_0 = arith.constant 0 : i32
    %c0_i32_1 = arith.constant 0 : i32
    return %c0_i32, %c0_i32_0 : i32, i32
  }
  func.func @transform_3(%arg0: i32) -> (i32, i32) {
    %c0_i32 = arith.constant 0 : i32
    %c0_i32_0 = arith.constant 0 : i32
    %c0_i32_1 = arith.constant 0 : i32
    return %c0_i32, %c0_i32_0 : i32, i32
  }
  func.func @transform_4(%arg0: i32) -> (i32, i32) {
    %c0_i32 = arith.constant 0 : i32
    %c0_i32_0 = arith.constant 0 : i32
    %c0_i32_1 = arith.constant 0 : i32
    return %c0_i32, %c0_i32_0 : i32, i32
  }
  func.func @transform_5(%arg0: i32) -> (i32, i32) {
    %c0_i32 = arith.constant 0 : i32
    %c0_i32_0 = arith.constant 0 : i32
    %c0_i32_1 = arith.constant 0 : i32
    return %c0_i32, %c0_i32_0 : i32, i32
  }
  func.func @transform_6(%arg0: i32) -> (i32, i32) {
    %c0_i32 = arith.constant 0 : i32
    %c0_i32_0 = arith.constant 0 : i32
    %c0_i32_1 = arith.constant 0 : i32
    return %c0_i32, %c0_i32_0 : i32, i32
  }
  func.func @transform_7(%arg0: i32) -> (i32, i32) {
    %c0_i32 = arith.constant 0 : i32
    %c0_i32_0 = arith.constant 0 : i32
    return %c0_i32, %arg0 : i32, i32
  }
}

</mosaic_0001>

<bundles_post_ra>
// kernel: tpu_custom_call.1
= control target key start
LH: loop header
LB: loop body
LE: loop exit
PB: predicated region body
PF: predicated region fallthrough
CT: control target
= control target key end

     0   :  { %vm80_vm0 = vcmask 1045504   ;;  %vm81_vm1 = vcmask 1046528   ;;  %v433_v2 = vmov 65535   ;;  %vm73_vm2 = vcmask 105472   ;;  %s543_s0 = inlined_call_operand.vmem [shape: bf16[13,128], index: 0, kind: input, shape index: {}]   ;;  %s544_s1 = inlined_call_operand.vmem [shape: bf16[26,13], index: 1, kind: input, shape index: {}]   ;;  %s545_s2 = inlined_call_operand.vmem [shape: f32[26,1], index: 2, kind: input, shape index: {}]   ;;  %s546_s3 = inlined_call_operand.vmem [shape: bf16[26,26], index: 3, kind: input, shape index: {}]   ;;  %s547_s4 = inlined_call_operand.vmem [shape: f32[26,1], index: 4, kind: input, shape index: {}]   ;;  %s548_s5 = inlined_call_operand.vmem [shape: bf16[3,26], index: 5, kind: input, shape index: {}]   ;;  %s549_s6 = inlined_call_operand.vmem [shape: f32[3,1], index: 6, kind: input, shape index: {}]   ;;  %s550_s7 = inlined_call_operand.hbm [shape: f32[3,128], index: 7, kind: output, shape index: {}]  }
   0x1   :  { %v388_v0 = vld [vmem:[%s543_s0] sm:$0x7f]   ;;  %v82_v3 = vsel %vm80_vm0, 4294967295, %v433_v2  ;;  %v434_v6 = vmov 0   ;;  %v36_v8 = vld [vmem:[%s545_s2 + $0x10] sm:$0xff]  ;;  %v35_v10 = vld [vmem:[%s545_s2 + $0x8] sm:$0xff] }
   0x2   :  { %v389_v1 = vld [vmem:[%s544_s1] sm:$0xff]   ;;  %v83_v4 = vsel %vm81_vm1, %v82_v3, 0  ;;  %386 = vset.pattern.permute.xlu0 %v434_v6  ;;  %387 = vset.pattern.permute.xlu1 %v434_v6  ;;  %v390_v9 = vld [vmem:[%s544_s1 + $0x8] sm:$0x1f]   ;;  %v37_v11 = vld [vmem:[%s545_s2 + $0x18] sm:$0x3] }
   0x3   :  { %360 = vmatprep.mubr.msk.bf16.mxu0 %vm73_vm2, %v389_v1  ;;  %v85_v5 = vand.u32 %v388_v0, %v83_v4  ;;  %v34_v7 = vld [vmem:[%s545_s2] sm:$0xff]  ;;  %50 = vperm.xlu1 %387, %v36_v8  }
   0x4   :  { %40 = vperm.xlu0 %386, %v34_v7  }
   0x5   :  { %358 = vmatprep.subr.bf16.mxu0 %v85_v5 }
   0x6   :  { %359 = vmatpush3.bf16.msra.mxu0 %v85_v5 }
   0x7   :  { %12 = vsyncpa [#allocation3], 0  ;;  %55 = vperm.xlu1 %387, %v37_v11   ;;  %v158_v12 = vld [vmem:[%s547_s4] sm:$0xff]  ;;  %v159_v13 = vld [vmem:[%s547_s4 + $0x8] sm:$0xff]  ;;  %vm192_vm3 = vcmask 211968   ;;  %vm199_vm4 = vcmask 1044480  }
   0x8   :  { %45 = vperm.xlu0 %386, %v35_v10   ;;  %v160_v14 = vld [vmem:[%s547_s4 + $0x10] sm:$0xff]  ;;  %v161_v15 = vld [vmem:[%s547_s4 + $0x18] sm:$0x3]  ;;  %v271_v16 = vld [vmem:[%s549_s6] sm:$0x7]  ;;  %v435_v50 = vmov 0.0  }
   0x9   :  { %361 = vmatmul.mubr.msk.bf16.vlgmr.msra.gmra.mrb[0].mxu0 %vm73_vm2, %v390_v9  ;;  %v391_v17 = vld [vmem:[%s546_s3] sm:$0xff]   ;;  %v392_v49 = vld [vmem:[%s546_s3 + $0x8] sm:$0x1f]   ;;  %372 = vmatprep.subr.bf16.mxu0 %v435_v50  ;;  %vm436_vm5 = vmmov 0   ;;  %s437_s25 = smov [#allocation2]  }
   0xa   :  { %368 = vmatprep.mubr.msk.bf16.mxu1 %vm192_vm3, %v391_v17  ;;  %376 = vmatprep.mubr.msk.bf16.mxu0 %vm436_vm5, %v435_v50  ;;  %s330_s26 = sshll.u32 %s437_s25, 4  ;;  %s331_s26 = int_to_ptr.vmem [resolvable:$true] %s330_s26 }
   0xb   :  { %169 = vperm.xlu1 %387, %v159_v13   ;;  %s409_s27 = scalar_lea.vmem %s331_s26, 64  ;;  %p414_p1 = scmp.lt.s32.totalorder %s331_s26, %s331_s26 }
   0xc   :  { %164 = vperm.xlu0 %386, %v158_v12   ;;  %p410_p0 = scmp.ne.s32.totalorder %s331_s26, %s409_s27  ;;  %p415_p2 = scmp.lt.s32.totalorder %s409_s27, %s409_s27 }
   0xe   :  { %p416_p3 = por %p415_p2, %p414_p1 }
   0xf   :  { %179 = vperm.xlu1 %387, %v161_v15  }
  0x10   :  { %174 = vperm.xlu0 %386, %v160_v14   ;;  %p417_p4 = pnand %p416_p3, %p410_p0 }
  0x14   :  { %274 = vperm.xlu0 %386, %v271_v16  }
  0x82   :  { %v51_v18 = vpop.permute.xlu1 %50 }
  0x83   :  { %v41_v19 = vpop.permute.xlu0 %40 }
  0x86   :  { %v56_v23 = vpop.permute.xlu1 %55 }
  0x87   :  { %v46_v26 = vpop.permute.xlu0 %45 }
  0x8a   :  { %v170_v52 = vpop.permute.xlu1 %169 }
  0x8b   :  { %v165_v51 = vpop.permute.xlu0 %164 }
  0x8e   :  { %v180_v57 = vpop.permute.xlu1 %179 }
  0x8f   :  { %v175_v53 = vpop.permute.xlu0 %174 }
  0xdc   :  { %v362_v20 = vpop.f32.mrb[0].mxu0 }
  0xdd   :  { %v130_v21 = vadd.f32 %v362_v20, %v51_v18  ;;  %v121_v22 = vpop.f32.mrb[1].mxu0  ;;  %v268_v18 = vld [vmem:[%s548_s5] sm:$0x3] }
  0xde   :  { %v122_v24 = vadd.f32 %v121_v22, %v41_v19  ;;  %v363_v25 = vpop.f32.mrb[2].mxu0  ;;  %v275_v19 = vpop.permute.xlu0 %274 }
  0xdf   :  { %v138_v27 = vmul.f32 0.5, %v130_v21  ;;  %v133_v28 = vadd.f32 %v363_v25, %v56_v23  ;;  %v124_v29 = vpop.f32.mrb[3].mxu0 }
  0xe0   :  { %v136_v30 = vmul.f32 0.5, %v122_v24  ;;  %v125_v31 = vadd.f32 %v124_v29, %v46_v26 }
  0xe1   :  { %393 = vtanh.f32 %v138_v27  ;;  %v139_v32 = vmul.f32 0.5, %v133_v28 }
  0xe2   :  { %395 = vtanh.f32 %v136_v30  ;;  %v137_v33 = vmul.f32 0.5, %v125_v31 }
  0xe3   :  { %397 = vtanh.f32 %v139_v32 }
  0xe4   :  { %399 = vtanh.f32 %v137_v33 }
  0xeb   :  { %v394_v34 = vpop.eup %393 }
  0xec   :  { %v396_v35 = vpop.eup %395  ;;  %v146_v36 = vmul.f32 0.5, %v394_v34 }
  0xed   :  { %v398_v37 = vpop.eup %397  ;;  %v144_v38 = vmul.f32 0.5, %v396_v35 }
  0xee   :  { %v400_v39 = vpop.eup %399  ;;  %v147_v40 = vmul.f32 0.5, %v398_v37  ;;  %v150_v42 = vadd.f32 0.5, %v146_v36 }
  0xef   :  { %v145_v41 = vmul.f32 0.5, %v400_v39  ;;  %v148_v44 = vadd.f32 0.5, %v144_v38 }
  0xf0   :  { %v151_v43 = vadd.f32 0.5, %v147_v40 }
  0xf1   :  { %v149_v45 = vadd.f32 0.5, %v145_v41 }
  0xf2   :  { %v157_v46 = vpack.c.bf16 %v151_v43, %v150_v42 }
  0xf3   :  { %v156_v47 = vpack.c.bf16 %v149_v45, %v148_v44 }
  0xf4   :  { %v201_v48 = vsel %vm199_vm4, %v157_v46, 0 }
  0xf5   :  { %364 = vmatprep.subr.bf16.mxu1 %v156_v47 }
  0xf6   :  { %365 = vmatpush3.bf16.msra.mxu1 %v156_v47 }
  0xf7   :  { %380 = vmatprep.subr.msk.bf16.mxu1 %vm199_vm4, %v157_v46 }
  0xfa   :  { %367 = vmatpush3.bf16.msra.mxu1 %v201_v48 }
  0xfd   :  { %369 = vmatmul.mubr.msk.bf16.vlgmr.msra.gmra.mrb[0].mxu1 %vm192_vm3, %v392_v49 }
 0x1d0   :  { %v370_v54 = vpop.f32.mrb[0].mxu1 }
 0x1d1   :  { %v246_v55 = vadd.f32 %v370_v54, %v175_v53  ;;  %v237_v56 = vpop.f32.mrb[1].mxu1 }
 0x1d2   :  { %v238_v58 = vadd.f32 %v237_v56, %v165_v51  ;;  %v371_v59 = vpop.f32.mrb[2].mxu1 }
 0x1d3   :  { %v254_v60 = vmul.f32 0.5, %v246_v55  ;;  %v249_v61 = vadd.f32 %v371_v59, %v180_v57  ;;  %v240_v62 = vpop.f32.mrb[3].mxu1 }
 0x1d4   :  { %v252_v63 = vmul.f32 0.5, %v238_v58  ;;  %v241_v0 = vadd.f32 %v240_v62, %v170_v52 }
 0x1d5   :  { %401 = vtanh.f32 %v254_v60  ;;  %v255_v1 = vmul.f32 0.5, %v249_v61 }
 0x1d6   :  { %403 = vtanh.f32 %v252_v63  ;;  %v253_v2 = vmul.f32 0.5, %v241_v0 }
 0x1d7   :  { %405 = vtanh.f32 %v255_v1 }
 0x1d8   :  { %407 = vtanh.f32 %v253_v2 }
 0x1df   :  { %v402_v3 = vpop.eup %401 }
 0x1e0   :  { %v404_v4 = vpop.eup %403  ;;  %v262_v5 = vmul.f32 0.5, %v402_v3 }
 0x1e1   :  { %v406_v6 = vpop.eup %405  ;;  %v260_v7 = vmul.f32 0.5, %v404_v4 }
 0x1e2   :  { %v408_v8 = vpop.eup %407  ;;  %v263_v9 = vmul.f32 0.5, %v406_v6  ;;  %v266_v11 = vadd.f32 0.5, %v262_v5 }
 0x1e3   :  { %v261_v10 = vmul.f32 0.5, %v408_v8  ;;  %v264_v13 = vadd.f32 0.5, %v260_v7 }
 0x1e4   :  { %v267_v12 = vadd.f32 0.5, %v263_v9 }
 0x1e5   :  { %v265_v14 = vadd.f32 0.5, %v261_v10 }
 0x1e6   :  { %v270_v15 = vpack.c.bf16 %v267_v12, %v266_v11 }
 0x1e7   :  { %v269_v16 = vpack.c.bf16 %v265_v14, %v264_v13 }
 0x1e8   :  { %v281_v17 = vsel %vm199_vm4, %v270_v15, 0 }
 0x1e9   :  { %373 = vmatpush3.bf16.msra.mxu0 %v269_v16 }
 0x1ea   :  { %374 = vmatprep.subr.bf16.mxu0 %v435_v50 }
 0x1ed   :  { %375 = vmatpush3.bf16.msra.mxu0 %v281_v17 }
 0x1f0   :  { %377 = vmatmul.mubr.msk.bf16.vlgmr.msra.gmra.mrb[4].mxu0 %vm192_vm3, %v268_v18 }
 0x2c3   :  { %v317_v20 = vpop.f32.mrb[4].mxu0 }
 0x2c4   :  { %v318_v21 = vadd.f32 %v317_v20, %v275_v19  ;;  %v378_v22 = vpop.f32.mrb[5].mxu0 }
 0x2c5   :  { %v320_v23 = vpop.f32.mrb[6].mxu0 }
 0x2c6   :  { %323 = vst [vmem:[#allocation2] sm:$0x7] %v318_v21  ;;  %v379_v24 = vpop.f32.mrb[7].mxu0 }
 0x2c7   :  { %420 = shalt.err (!%p417_p4)
}
 0x2c8   :  { %s421_s29 = scalar_lea.hbm %s550_s7, 64 }
 0x2c9   :  { %p422_p5 = scmp.ne.s32.totalorder %s550_s7, %s421_s29  ;;  %p425_p6 = scmp.lt.u32.totalorder %s421_s29, %s550_s7 }
 0x2cb   :  { %p427_p7 = pnand %p425_p6, %p422_p5 }
 0x2cd   :  { %430 = shalt.err (!%p427_p7)
}
 0x2ce   :  { %333 = dma.vmem_to_hbm [thread:$0]  %s331_s26, 64, %s550_s7, [#allocation3]  }
 0x2cf   :  { %431 = dma.done.wait [#allocation3], 64  }
 0x2d0   :  { %432 = vsyncadd [#allocation3], 4294967232 }
 0x2d1   :  { %337 = vsyncpa [#allocation3], 1 }

</bundles_post_ra>
